<compile_context>
chip_gen: v5e
topology: v5e:2x2
jax: 0.10.0
libtpu: 0.0.40
codegen_flags: <defaults>
</compile_context>

<pallas_src>
import functools
import math

import jax
import jax.numpy as jnp
from jax.experimental import pallas as pl
from jax.experimental.pallas import tpu as pltpu


def _round_up(x, m):
    return ((x + m - 1) // m) * m


def _iass_kernel(preds_flat_ref, feats_ref, preds_bce_ref, gt_ref,
                 out_ref, acc_ref, *, n_valid, hw_valid, nb):
    i = pl.program_id(0)                 # instance-block index ("parallel")
    j = pl.program_id(1)                 # K-chunk (reduction) index
    j_last = pl.num_programs(1) - 1

    # ---- broadcast-dot partial: lane-deferred accumulation (VPU only) -----
    @pl.when(j == 0)
    def _zero_acc():
        acc_ref[...] = jnp.zeros_like(acc_ref)

    # (Nb, Kc) += (Nb, Kc) * (1, Kc)  — sublane broadcast, no XLU in the hot loop
    acc_ref[...] += feats_ref[...] * preds_flat_ref[...]

    # rows of this block that correspond to real instances
    row = jax.lax.broadcasted_iota(jnp.int32, (nb, 1), 0) + i * nb
    valid = row < n_valid                                     # (Nb, 1) bool

    # ---- mask BCE-with-logits: once per instance block (first K chunk) ----
    @pl.when(j == 0)
    def _mask_bce():
        x = preds_bce_ref[...]                                # (Nb, HWp) logits
        g = gt_ref[...]                                       # (Nb, HWp)
        bce = jnp.maximum(x, 0.0) - x * g + jnp.log1p(jnp.exp(-jnp.abs(x)))
        col = jax.lax.broadcasted_iota(jnp.int32, x.shape, 1)
        keep = jnp.logical_and(valid, col < hw_valid)         # mask HW + row pads
        out_ref[0, 1] = jnp.sum(jnp.where(keep, bce, 0.0))

    # ---- classification BCE: after the last K chunk ------------------------
    @pl.when(j == j_last)
    def _cls_bce():
        score = jnp.sum(acc_ref[...], axis=-1, keepdims=True)  # (Nb, 1)
        p = jax.nn.sigmoid(score)
        target = jnp.where(
            jnp.sum(gt_ref[...], axis=-1, keepdims=True) > 0.0, 1.0, 0.0)
        # F.binary_cross_entropy clamps its log outputs at -100.
        log_p = jnp.maximum(jnp.log(p), -100.0)
        log_1mp = jnp.maximum(jnp.log(1.0 - p), -100.0)
        cls = -(target * log_p + (1.0 - target) * log_1mp)     # (Nb, 1)
        out_ref[0, 0] = jnp.sum(jnp.where(valid, cls, 0.0))


def iass_loss(mask_preds, mask_feats, gt_masks, gt_labels=None, *,
              instance_block=8, k_chunk_max=32768):
    """Instance-aware semantic segmentation loss (scalar float32)."""
    n, h, w = mask_preds.shape
    nf, f, hf, wf = mask_feats.shape
    assert (nf, hf, wf) == (n, h, w)
    assert gt_masks.shape == (n, h, w)
    # torch broadcasting of (N,H,W) with (N,F,H,W) requires N == F
    assert n == f, "torch broadcasting in the reference module requires N == F"

    hw = h * w
    hwp = _round_up(hw, 128)                       # lane-dense spatial axis

    # instance blocking: either one block covering all N, or multiples of 8
    nb = n if n <= instance_block else _round_up(instance_block, 8)
    n_blocks = -(-n // nb)
    np_ = n_blocks * nb

    # flattened score-contraction axis K = F * HWp, chunked in multiples of 128
    k = f * hwp
    kc = min(_round_up(k, 128), _round_up(k_chunk_max, 128))
    k_blocks = -(-k // kc)
    kp = k_blocks * kc

    fp32 = jnp.float32
    preds2 = mask_preds.reshape(n, hw).astype(fp32)
    gt2 = gt_masks.reshape(n, hw).astype(fp32)
    feats3 = mask_feats.reshape(n, f, hw).astype(fp32)
    if hwp != hw:                                   # zero-pad spatial lanes
        preds2 = jnp.pad(preds2, ((0, 0), (0, hwp - hw)))
        gt2 = jnp.pad(gt2, ((0, 0), (0, hwp - hw)))
        feats3 = jnp.pad(feats3, ((0, 0), (0, 0), (0, hwp - hw)))

    preds_flat = preds2.reshape(1, k)               # (1, F*HWp) — score operand
    feats2 = feats3.reshape(n, k)                   # (N, F*HWp)
    if kp != k:                                     # zero-pad K (contributes 0)
        preds_flat = jnp.pad(preds_flat, ((0, 0), (0, kp - k)))
        feats2 = jnp.pad(feats2, ((0, 0), (0, kp - k)))
    if np_ != n:                                    # zero-pad instance rows
        feats2 = jnp.pad(feats2, ((0, np_ - n), (0, 0)))
        preds2 = jnp.pad(preds2, ((0, np_ - n), (0, 0)))
        gt2 = jnp.pad(gt2, ((0, np_ - n), (0, 0)))

    # explicit VMEM budget for the chosen blocks (+ headroom)
    est = 4 * (2 * nb * kc            # feats chunk, double-buffered
               + 2 * 8 * kc           # preds_flat chunk (sublane-padded)
               + 2 * 2 * nb * hwp     # preds_bce + gt blocks
               + nb * kc)             # score accumulator scratch
    vmem_limit = int(min(max(est + (8 << 20), 32 << 20), 64 << 20))

    kernel = functools.partial(_iass_kernel, n_valid=n, hw_valid=hw, nb=nb)
    partials = pl.pallas_call(
        kernel,
        out_shape=jax.ShapeDtypeStruct((n_blocks, 2), jnp.float32),
        grid_spec=pltpu.PrefetchScalarGridSpec(
            num_scalar_prefetch=0,
            grid=(n_blocks, k_blocks),
            in_specs=[
                pl.BlockSpec((1, kc), lambda i, j: (0, j)),     # preds (score)
                pl.BlockSpec((nb, kc), lambda i, j: (i, j)),    # feats chunk
                pl.BlockSpec((nb, hwp), lambda i, j: (i, 0)),   # preds (mask BCE)
                pl.BlockSpec((nb, hwp), lambda i, j: (i, 0)),   # gt masks
            ],
            out_specs=pl.BlockSpec((1, 2), lambda i, j: (i, 0),
                                   memory_space=pltpu.SMEM),
            scratch_shapes=[pltpu.VMEM((nb, kc), jnp.float32)],
        ),
        compiler_params=pltpu.CompilerParams(
            dimension_semantics=("parallel", "arbitrary"),
            vmem_limit_bytes=vmem_limit),
    )(preds_flat, feats2, preds2, gt2)

    cls_loss = jnp.sum(partials[:, 0]) / n
    mask_loss = jnp.sum(partials[:, 1]) / (n * h * w)
    return cls_loss + mask_loss


def _reference(mask_preds, mask_feats, gt_masks):
    """Pure-JAX reference with the same math as the PyTorch module."""
    scores = jax.nn.sigmoid(jnp.sum(mask_preds * mask_feats, axis=(1, 2, 3)))
    targets = jnp.where(jnp.sum(gt_masks, axis=(1, 2)) > 0, 1.0, 0.0)
    cls = jnp.mean(-(targets * jnp.maximum(jnp.log(scores), -100.0)
                     + (1.0 - targets) * jnp.maximum(jnp.log(1.0 - scores), -100.0)))
    x = mask_preds
    bce = jnp.maximum(x, 0.0) - x * gt_masks + jnp.log1p(jnp.exp(-jnp.abs(x)))
    return cls + jnp.mean(bce)


if __name__ == "__main__":
    key = jax.random.PRNGKey(0)
    k1, k2, k3, k4 = jax.random.split(key, 4)

    # --- primary test: small shapes consistent with the module (N == F) ----
    N, F_, H, W = 4, 4, 16, 16
    mask_preds = jax.random.normal(k1, (N, H, W), dtype=jnp.float32)
    mask_feats = jax.random.normal(k2, (N, F_, H, W), dtype=jnp.float32) * 0.05
    gt_masks = (jax.random.uniform(k3, (N, H, W)) > 0.5).astype(jnp.float32)
    gt_labels = jax.random.randint(k4, (N,), 0, 10)   # unused by forward

    loss = iass_loss(mask_preds, mask_feats, gt_masks, gt_labels)
    loss = jax.block_until_ready(loss)
    ref = _reference(mask_preds, mask_feats, gt_masks)
    assert jnp.isfinite(loss), "loss is not finite"
    assert jnp.allclose(loss, ref, rtol=1e-4, atol=1e-4), (loss, ref)

    # --- stress test: exercises row/lane/K padding, multi-instance blocks
    #     (parallel axis) and multi-chunk score accumulation -----------------
    k5, k6, k7 = jax.random.split(jax.random.PRNGKey(1), 3)
    N2, H2, W2 = 10, 12, 12
    preds2 = jax.random.normal(k5, (N2, H2, W2), dtype=jnp.float32)
    feats2 = jax.random.normal(k6, (N2, N2, H2, W2), dtype=jnp.float32) * 0.05
    gts2 = (jax.random.uniform(k7, (N2, H2, W2)) > 0.5).astype(jnp.float32)

    loss2 = iass_loss(preds2, feats2, gts2, None,
                      instance_block=8, k_chunk_max=768)
    loss2 = jax.block_until_ready(loss2)
    ref2 = _reference(preds2, feats2, gts2)
    assert jnp.isfinite(loss2), "loss2 is not finite"
    assert jnp.allclose(loss2, ref2, rtol=1e-4, atol=1e-4), (loss2, ref2)

    print("KERNEL_OK")
</pallas_src>

<mosaic_0001>
module attributes {stable_mosaic.version = 11 : i64} {
  func.func @_iass_kernel(%arg0: i32, %arg1: i32, %arg2: memref<1x1024xf32, #tpu.memory_space<vmem>>, %arg3: memref<4x1024xf32, #tpu.memory_space<vmem>>, %arg4: memref<4x256xf32, #tpu.memory_space<vmem>>, %arg5: memref<4x256xf32, #tpu.memory_space<vmem>>, %arg6: memref<1x2xf32, #tpu.memory_space<smem>>, %arg7: memref<4x1024xf32, #tpu.memory_space<vmem>>) attributes {dimension_semantics = [#tpu.dimension_semantics<parallel>, #tpu.dimension_semantics<arbitrary>], iteration_bounds = array<i64: 1, 1>, scalar_prefetch = 0 : i64, scratch_operands = 1 : i64, tpu.core_type = #tpu.core_type<tc>, window_params = [{transform_indices = @transform_0, window_bounds = array<i64: 1, 1024>}, {transform_indices = @transform_1, window_bounds = array<i64: 4, 1024>}, {transform_indices = @transform_2, window_bounds = array<i64: 4, 256>}, {transform_indices = @transform_3, window_bounds = array<i64: 4, 256>}, {transform_indices = @transform_4, window_bounds = array<i64: 1, 2>}]} {
    %c0_i32 = arith.constant 0 : i32
    %0 = arith.cmpi eq, %arg1, %c0_i32 : i32
    %1 = arith.extui %0 : i1 to i32
    %c0_i32_0 = arith.constant 0 : i32
    %2 = arith.cmpi ne, %1, %c0_i32_0 : i32
    scf.if %2 {
      %cst = arith.constant 0.000000e+00 : f32
      %22 = vector.broadcast %cst : f32 to vector<4x1024xf32>
      %c0_13 = arith.constant 0 : index
      %c0_14 = arith.constant 0 : index
      %23 = vector.load %arg7[%c0_13, %c0_14] : memref<4x1024xf32, #tpu.memory_space<vmem>>, vector<4x1024xf32>
      tpu.vector_store %arg7[%c0_13, %c0_14], %22 {strides = array<i32>} : memref<4x1024xf32, #tpu.memory_space<vmem>>, vector<4x1024xf32>,
    } else {
    }
    %c0 = arith.constant 0 : index
    %c0_1 = arith.constant 0 : index
    %3 = vector.load %arg7[%c0, %c0_1] : memref<4x1024xf32, #tpu.memory_space<vmem>>, vector<4x1024xf32>
    %c0_2 = arith.constant 0 : index
    %c0_3 = arith.constant 0 : index
    %4 = vector.load %arg3[%c0_2, %c0_3] : memref<4x1024xf32, #tpu.memory_space<vmem>>, vector<4x1024xf32>
    %c0_4 = arith.constant 0 : index
    %c0_5 = arith.constant 0 : index
    %5 = vector.load %arg2[%c0_4, %c0_5] : memref<1x1024xf32, #tpu.memory_space<vmem>>, vector<1x1024xf32>
    %6 = vector.broadcast %5 : vector<1x1024xf32> to vector<4x1024xf32>
    %7 = arith.mulf %4, %6 : vector<4x1024xf32>
    %8 = arith.addf %3, %7 : vector<4x1024xf32>
    %c0_6 = arith.constant 0 : index
    %c0_7 = arith.constant 0 : index
    %9 = vector.load %arg7[%c0_6, %c0_7] : memref<4x1024xf32, #tpu.memory_space<vmem>>, vector<4x1024xf32>
    tpu.vector_store %arg7[%c0_6, %c0_7], %8 {strides = array<i32>} : memref<4x1024xf32, #tpu.memory_space<vmem>>, vector<4x1024xf32>,
    %10 = tpu.iota {dimensions = array<i32: 0>} : vector<4x1xi32>
    %c4_i32 = arith.constant 4 : i32
    %11 = arith.muli %arg0, %c4_i32 : i32
    %12 = vector.broadcast %11 : i32 to vector<4x1xi32>
    %13 = arith.addi %10, %12 : vector<4x1xi32>
    %c4_i32_8 = arith.constant 4 : i32
    %14 = vector.broadcast %c4_i32_8 : i32 to vector<4x1xi32>
    %15 = arith.cmpi slt, %13, %14 : vector<4x1xi32>
    %c0_i32_9 = arith.constant 0 : i32
    %16 = arith.cmpi eq, %arg1, %c0_i32_9 : i32
    %17 = arith.extui %16 : i1 to i32
    %c0_i32_10 = arith.constant 0 : i32
    %18 = arith.cmpi ne, %17, %c0_i32_10 : i32
    scf.if %18 {
      %c0_13 = arith.constant 0 : index
      %c0_14 = arith.constant 0 : index
      %22 = vector.load %arg4[%c0_13, %c0_14] : memref<4x256xf32, #tpu.memory_space<vmem>>, vector<4x256xf32>
      %c0_15 = arith.constant 0 : index
      %c0_16 = arith.constant 0 : index
      %23 = vector.load %arg5[%c0_15, %c0_16] : memref<4x256xf32, #tpu.memory_space<vmem>>, vector<4x256xf32>
      %cst = arith.constant 0.000000e+00 : f32
      %24 = vector.broadcast %cst : f32 to vector<4x256xf32>
      %25 = arith.maximumf %22, %24 : vector<4x256xf32>
      %26 = arith.mulf %22, %23 : vector<4x256xf32>
      %27 = arith.subf %25, %26 : vector<4x256xf32>
      %28 = math.absf %22 : vector<4x256xf32>
      %cst_17 = arith.constant 0.000000e+00 : f32
      %29 = vector.broadcast %cst_17 : f32 to vector<4x256xf32>
      %30 = arith.subf %29, %28 : vector<4x256xf32>
      %31 = math.exp %30 : vector<4x256xf32>
      %32 = math.log1p %31 : vector<4x256xf32>
      %33 = arith.addf %27, %32 : vector<4x256xf32>
      %34 = tpu.iota {dimensions = array<i32: 1>} : vector<4x256xi32>
      %c256_i32 = arith.constant 256 : i32
      %35 = vector.broadcast %c256_i32 : i32 to vector<4x256xi32>
      %36 = arith.cmpi slt, %34, %35 : vector<4x256xi32>
      %37 = vector.broadcast %15 : vector<4x1xi1> to vector<4x256xi1>
      %38 = arith.andi %37, %36 : vector<4x256xi1>
      %cst_18 = arith.constant 0.000000e+00 : f32
      %39 = vector.broadcast %cst_18 : f32 to vector<4x256xf32>
      %40 = arith.select %38, %33, %39 : vector<4x256xi1>, vector<4x256xf32>
      %41 = vector.shape_cast %40 : vector<4x256xf32> to vector<1x4x256xf32>
      %cst_19 = arith.constant dense<0.000000e+00> : vector<1xf32>
      %42 = vector.multi_reduction <add>, %41, %cst_19 [1, 2] : vector<1x4x256xf32> to vector<1xf32>
      %43 = vector.shape_cast %42 : vector<1xf32> to vector<1x1x1xf32>
      %44 = vector.extract %43[0, 0, 0] : f32 from vector<1x1x1xf32>
      %c0_20 = arith.constant 0 : index
      %c1 = arith.constant 1 : index
      %45 = memref.load %arg6[%c0_20, %c1] : memref<1x2xf32, #tpu.memory_space<smem>>
      memref.store %44, %arg6[%c0_20, %c1] : memref<1x2xf32, #tpu.memory_space<smem>>
    } else {
    }
    %c0_i32_11 = arith.constant 0 : i32
    %19 = arith.cmpi eq, %arg1, %c0_i32_11 : i32
    %20 = arith.extui %19 : i1 to i32
    %c0_i32_12 = arith.constant 0 : i32
    %21 = arith.cmpi ne, %20, %c0_i32_12 : i32
    scf.if %21 {
      %c0_13 = arith.constant 0 : index
      %c0_14 = arith.constant 0 : index
      %22 = vector.load %arg7[%c0_13, %c0_14] : memref<4x1024xf32, #tpu.memory_space<vmem>>, vector<4x1024xf32>
      %cst = arith.constant dense<0.000000e+00> : vector<4xf32>
      %23 = vector.multi_reduction <add>, %22, %cst [1] : vector<4x1024xf32> to vector<4xf32>
      %24 = vector.shape_cast %23 : vector<4xf32> to vector<4x1xf32>
      %25 = arith.negf %24 : vector<4x1xf32>
      %26 = math.exp %25 : vector<4x1xf32>
      %cst_15 = arith.constant 1.000000e+00 : f32
      %27 = vector.broadcast %cst_15 : f32 to vector<4x1xf32>
      %28 = arith.addf %27, %26 : vector<4x1xf32>
      %29 = arith.divf %27, %28 : vector<4x1xf32>
      %c0_16 = arith.constant 0 : index
      %c0_17 = arith.constant 0 : index
      %30 = vector.load %arg5[%c0_16, %c0_17] : memref<4x256xf32, #tpu.memory_space<vmem>>, vector<4x256xf32>
      %cst_18 = arith.constant dense<0.000000e+00> : vector<4xf32>
      %31 = vector.multi_reduction <add>, %30, %cst_18 [1] : vector<4x256xf32> to vector<4xf32>
      %32 = vector.shape_cast %31 : vector<4xf32> to vector<4x1xf32>
      %cst_19 = arith.constant 0.000000e+00 : f32
      %33 = vector.broadcast %cst_19 : f32 to vector<4x1xf32>
      %34 = arith.cmpf ogt, %32, %33 : vector<4x1xf32>
      %cst_20 = arith.constant 1.000000e+00 : f32
      %cst_21 = arith.constant 0.000000e+00 : f32
      %35 = vector.broadcast %cst_20 : f32 to vector<4x1xf32>
      %36 = vector.broadcast %cst_21 : f32 to vector<4x1xf32>
      %37 = arith.select %34, %35, %36 : vector<4x1xi1>, vector<4x1xf32>
      %38 = math.log %29 : vector<4x1xf32>
      %cst_22 = arith.constant -1.000000e+02 : f32
      %39 = vector.broadcast %cst_22 : f32 to vector<4x1xf32>
      %40 = arith.maximumf %38, %39 : vector<4x1xf32>
      %cst_23 = arith.constant 1.000000e+00 : f32
      %41 = vector.broadcast %cst_23 : f32 to vector<4x1xf32>
      %42 = arith.subf %41, %29 : vector<4x1xf32>
      %43 = math.log %42 : vector<4x1xf32>
      %cst_24 = arith.constant -1.000000e+02 : f32
      %44 = vector.broadcast %cst_24 : f32 to vector<4x1xf32>
      %45 = arith.maximumf %43, %44 : vector<4x1xf32>
      %46 = arith.mulf %37, %40 : vector<4x1xf32>
      %cst_25 = arith.constant 1.000000e+00 : f32
      %47 = vector.broadcast %cst_25 : f32 to vector<4x1xf32>
      %48 = arith.subf %47, %37 : vector<4x1xf32>
      %49 = arith.mulf %48, %45 : vector<4x1xf32>
      %50 = arith.addf %46, %49 : vector<4x1xf32>
      %cst_26 = arith.constant 0.000000e+00 : f32
      %51 = vector.broadcast %cst_26 : f32 to vector<4x1xf32>
      %52 = arith.subf %51, %50 : vector<4x1xf32>
      %cst_27 = arith.constant 0.000000e+00 : f32
      %53 = vector.broadcast %cst_27 : f32 to vector<4x1xf32>
      %54 = arith.select %15, %52, %53 : vector<4x1xi1>, vector<4x1xf32>
      %55 = vector.shape_cast %54 : vector<4x1xf32> to vector<1x4x1xf32>
      %cst_28 = arith.constant dense<0.000000e+00> : vector<1xf32>
      %56 = vector.multi_reduction <add>, %55, %cst_28 [1, 2] : vector<1x4x1xf32> to vector<1xf32>
      %57 = vector.shape_cast %56 : vector<1xf32> to vector<1x1x1xf32>
      %58 = vector.extract %57[0, 0, 0] : f32 from vector<1x1x1xf32>
      %c0_29 = arith.constant 0 : index
      %c0_30 = arith.constant 0 : index
      %59 = memref.load %arg6[%c0_29, %c0_30] : memref<1x2xf32, #tpu.memory_space<smem>>
      memref.store %58, %arg6[%c0_29, %c0_30] : memref<1x2xf32, #tpu.memory_space<smem>>
    } else {
    }
    return
  }
  func.func @transform_0(%arg0: i32, %arg1: i32) -> (i32, i32) {
    %c0_i32 = arith.constant 0 : i32
    %c0_i32_0 = arith.constant 0 : i32
    return %c0_i32, %arg1 : i32, i32
  }
  func.func @transform_1(%arg0: i32, %arg1: i32) -> (i32, i32) {
    %c0_i32 = arith.constant 0 : i32
    return %arg0, %arg1 : i32, i32
  }
  func.func @transform_2(%arg0: i32, %arg1: i32) -> (i32, i32) {
    %c0_i32 = arith.constant 0 : i32
    %c0_i32_0 = arith.constant 0 : i32
    return %arg0, %c0_i32 : i32, i32
  }
  func.func @transform_3(%arg0: i32, %arg1: i32) -> (i32, i32) {
    %c0_i32 = arith.constant 0 : i32
    %c0_i32_0 = arith.constant 0 : i32
    return %arg0, %c0_i32 : i32, i32
  }
  func.func @transform_4(%arg0: i32, %arg1: i32) -> (i32, i32) {
    %c0_i32 = arith.constant 0 : i32
    %c0_i32_0 = arith.constant 0 : i32
    return %arg0, %c0_i32 : i32, i32
  }
}

</mosaic_0001>

<bundles_post_ra>
// kernel: tpu_custom_call.1
= control target key start
LH: loop header
LB: loop body
LE: loop exit
PB: predicated region body
PF: predicated region fallthrough
CT: control target
= control target key end

     0   :  { %9 = vsyncpa [#allocation4], 0  ;;  %s512_s0 = inlined_call_operand.hbm [shape: f32[1,1024], index: 0, kind: input, shape index: {}]   ;;  %s513_s1 = inlined_call_operand.hbm [shape: f32[4,1024], index: 1, kind: input, shape index: {}]   ;;  %s514_s2 = inlined_call_operand.hbm [shape: f32[4,256], index: 2, kind: input, shape index: {}]   ;;  %s515_s3 = inlined_call_operand.hbm [shape: f32[4,256], index: 3, kind: input, shape index: {}]   ;;  %s516_s4 = inlined_call_operand.hbm [shape: f32[1,2], index: 4, kind: output, shape index: {}]  }
   0x1   :  { %10 = vsyncpa [#allocation7], 0 }
   0x2   :  { %11 = vsyncpa [#allocation10], 0  ;;  %s29_s17 = sshll.u32 %s513_s1, 4  ;;  %s30_s17 = int_to_ptr.hbm [resolvable:$true] %s29_s17 }
   0x3   :  { %12 = vsyncpa [#allocation5], 0  ;;  %s447_s18 = smov [#allocation6]   ;;  %s18_s22 = sshll.u32 %s512_s0, 4  ;;  %s19_s22 = int_to_ptr.hbm [resolvable:$true] %s18_s22 }
   0x4   :  { %s31_s19 = sshll.u32 %s447_s18, 4  ;;  %s448_s23 = smov [#allocation3]   ;;  %s32_s19 = int_to_ptr.vmem [resolvable:$true] %s31_s19 }
   0x5   :  { %34 = dma.hbm_to_vmem [thread:$0]  %s30_s17, 512, %s32_s19, [#allocation7]  }
   0x6   :  { %s20_s24 = sshll.u32 %s448_s23, 4  ;;  %s40_s27 = sshll.u32 %s514_s2, 4  ;;  %s21_s24 = int_to_ptr.vmem [resolvable:$true] %s20_s24  ;;  %s41_s27 = int_to_ptr.hbm [resolvable:$true] %s40_s27 }
   0x7   :  { %23 = dma.hbm_to_vmem [thread:$0]  %s19_s22, 128, %s21_s24, [#allocation4]  }
   0x8   :  { %s51_s29 = sshll.u32 %s515_s3, 4  ;;  %s449_s30 = smov [#allocation8]   ;;  %s52_s29 = int_to_ptr.hbm [resolvable:$true] %s51_s29 }
   0x9   :  { %s42_s5 = sshll.u32 %s449_s30, 4  ;;  %s450_s0 = smov [#allocation9]   ;;  %s43_s5 = int_to_ptr.vmem [resolvable:$true] %s42_s5 }
   0xa   :  { %45 = dma.hbm_to_vmem [thread:$0]  %s41_s27, 128, %s43_s5, [#allocation7]  }
   0xb   :  { %s53_s6 = sshll.u32 %s450_s0, 4  ;;  %s54_s6 = int_to_ptr.vmem [resolvable:$true] %s53_s6 }
   0xc   :  { %56 = dma.hbm_to_vmem [thread:$0]  %s52_s29, 128, %s54_s6, [#allocation10]  }
   0xd   :  { %439 = dma.done.wait [#allocation4], 128  }
   0xe   :  { %440 = vsyncadd [#allocation4], 4294967168 }
   0xf   :  { %441 = dma.done.wait [#allocation7], 640  }
  0x10   :  { %442 = vsyncadd [#allocation7], 4294966656 }
  0x11   :  { %443 = dma.done.wait [#allocation10], 128  }
  0x12   :  { %444 = vsyncadd [#allocation10], 4294967168  ;;  %v89_v0 = vld [vmem:[#allocation3] sm:$0xff]  ;;  %v133_v3 = vld [vmem:[#allocation8] sm:$0xff]  ;;  %vm103_vm0 = vcmask 1043456   ;;  %vm277_vm8 = vcmask 3072  }
  0x13   :  { %v93_v1 = vperm.slane %v89_v0, 2  ;;  %v94_v2 = vperm.slane %v89_v0, 3  ;;  %v95_v4 = vperm.slane %v89_v0, 4  ;;  %v96_v5 = vperm.slane %v89_v0, 5  ;;  %v86_v8 = vld [vmem:[#allocation6 + $0x8] sm:$0xff]  ;;  %v87_v10 = vld [vmem:[#allocation6 + $0x10] sm:$0xff] }
  0x14   :  { %v97_v6 = vperm.slane %v89_v0, 6  ;;  %v98_v7 = vperm.slane %v89_v0, 7  ;;  %v88_v11 = vld [vmem:[#allocation6 + $0x18] sm:$0xff]  ;;  %v138_v14 = vand.u32 2147483647, %v133_v3  ;;  %v134_v26 = vld [vmem:[#allocation9] sm:$0xff] }
  0x15   :  { %v100_v9 = vrot.slane %v94_v2, 4  ;;  %v101_v12 = vrot.slane %v96_v5, 4  ;;  %v135_v28 = vmax.f32 %v133_v3, 0.0  ;;  %v136_v29 = vmul.f32 %v134_v26, %v133_v3  ;;  %v85_v40 = vld [vmem:[#allocation6] sm:$0xff]  ;;  %s295_s8 = sshll.u32 %s516_s4, 4  ;;  %s452_s10 = smov [#allocation11]   ;;  %s296_s8 = int_to_ptr.hbm [resolvable:$true] %s295_s8 }
  0x16   :  { %v102_v13 = vrot.slane %v98_v7, 4  ;;  %v139_v21 = vsub.f32 0.0, %v138_v14  ;;  %v92_v31 = vperm.slane %v89_v0, 1  ;;  %v91_v36 = vperm.slane %v89_v0, 0 }
  0x17   :  { %v105_v15 = vsel %vm103_vm0, %v93_v1, %v100_v9  ;;  %v106_v16 = vsel %vm103_vm0, %v95_v4, %v101_v12  ;;  %v137_v34 = vsub.f32 %v135_v28, %v136_v29  ;;  %v124_v9 = vlaneseq }
  0x18   :  { %v107_v17 = vsel %vm103_vm0, %v97_v6, %v102_v13  ;;  %v113_v18 = vmul.f32 %v105_v15, %v86_v8  ;;  %v114_v19 = vmul.f32 %v106_v16, %v87_v10  ;;  %v140_v22 = vmul.f32 1.442695, %v139_v21 }
  0x19   :  { %v115_v20 = vmul.f32 %v107_v17, %v88_v11  ;;  %v99_v37 = vrot.slane %v92_v31, 4  ;;  %v125_v10 = vshrl.u32 %v124_v9, 7 }
  0x1a   :  { %193 = vst [vmem:[#allocation1 + $0x10] ss:$2 sm:$0xff] %v113_v18  ;;  %319 = vpow2.f32 %v140_v22 }
  0x1b   :  { %195 = vst [vmem:[#allocation1 + $0x20] ss:$2 sm:$0xff] %v114_v19  ;;  %v104_v41 = vsel %vm103_vm0, %v91_v36, %v99_v37  ;;  %vm129_vm2 = vcmp.lt.s32.totalorder %v125_v10, 4 }
  0x1c   :  { %197 = vst [vmem:[#allocation1 + $0x30] ss:$2 sm:$0xff] %v115_v20  ;;  %v112_v42 = vmul.f32 %v104_v41, %v85_v40 }
  0x20   :  { %v320_v23 = vpop.eup %319 }
  0x21   :  { %v142_v24 = vadd.f32 1.0, %v320_v23  ;;  %v145_v25 = vmul.f32 -0.5, %v320_v23  ;;  %v148_v30 = vand.u32 2147483647, %v320_v23 }
  0x22   :  { %v200_v45 = vld.sshfl [vmem:[#allocation1 + $0x10] sm:$0xff pattern:$0x75316420]  ;;  %v201_v46 = vld.sshfl [vmem:[#allocation1 + $0x18] sm:$0xff pattern:$0x75316420] }
  0x23   :  { %321 = vlog2.f32 %v142_v24  ;;  %v146_v27 = vadd.f32 1.0, %v145_v25  ;;  %vm149_vm1 = vcmp.lt.f32.partialorder %v148_v30, 0.0004427343  ;;  %v217_v51 = vsel %vm103_vm0, %v200_v45, 0.0 }
  0x24   :  { %v202_v52 = vld.sshfl [vmem:[#allocation1 + $0x20] sm:$0xff pattern:$0x75316420]  ;;  %v219_v54 = vsel %vm103_vm0, %v201_v46, 0.0 }
  0x25   :  { %v147_v32 = vmul.f32 %v320_v23, %v146_v27  ;;  %v203_v55 = vld.sshfl [vmem:[#allocation1 + $0x28] sm:$0xff pattern:$0x75316420]  ;;  %v221_v57 = vsel %vm103_vm0, %v202_v52, 0.0 }
  0x26   :  { %v204_v58 = vld.sshfl [vmem:[#allocation1 + $0x30] sm:$0xff pattern:$0x75316420]  ;;  %v223_v60 = vsel %vm103_vm0, %v203_v55, 0.0 }
  0x27   :  { %v205_v61 = vld.sshfl [vmem:[#allocation1 + $0x38] sm:$0xff pattern:$0x75316420]  ;;  %v225_v63 = vsel %vm103_vm0, %v204_v58, 0.0 }
  0x28   :  { %v227_v1 = vsel %vm103_vm0, %v205_v61, 0.0 }
  0x29   :  { %v322_v33 = vpop.eup %321 }
  0x2a   :  { %v144_v35 = vmul.f32 0.6931472, %v322_v33  ;;  %v451_v33 = vmov 0.0  }
  0x2c   :  { %v150_v38 = vsel %vm149_vm1, %v147_v32, %v144_v35 }
  0x2d   :  { %v151_v39 = vadd.f32 %v150_v38, %v137_v34 }
  0x2f   :  { %162 = vst [vmem:[#allocation1] ss:$2 sm:$0xff] %v151_v39 }
  0x36   :  { %v163_v43 = vld.sshfl [vmem:[#allocation1] sm:$0xff pattern:$0x75316420]  ;;  %v164_v44 = vld.sshfl [vmem:[#allocation1 + $0x8] sm:$0xff pattern:$0x75316420] }
  0x37   :  { %191 = vst [vmem:[#allocation1] ss:$2 sm:$0xff] %v112_v42  ;;  %v167_v11 = vsel %vm129_vm2, %v163_v43, 0.0  ;;  %v168_v12 = vsel %vm129_vm2, %v164_v44, 0.0 }
  0x38   :  { %v169_v13 = vsel %vm103_vm0, %v167_v11, 0.0  ;;  %v170_v14 = vsel %vm103_vm0, %v168_v12, 0.0 }
  0x39   :  { %v171_v15 = vadd.f32 %v170_v14, %v169_v13 }
  0x3b   :  { %172 = vadd.xlane.f32.xlu1 %v171_v15 }
  0x3e   :  { %v198_v47 = vld.sshfl [vmem:[#allocation1] sm:$0xff pattern:$0x75316420]  ;;  %v199_v48 = vld.sshfl [vmem:[#allocation1 + $0x8] sm:$0xff pattern:$0x75316420] }
  0x3f   :  { %v214_v49 = vsel %vm103_vm0, %v198_v47, 0.0  ;;  %v215_v50 = vsel %vm103_vm0, %v199_v48, 0.0  ;;  %252 = vst [vmem:[#allocation1] ss:$2 sm:$0xff] %v134_v26 }
  0x40   :  { %v216_v53 = vadd.f32 %v215_v50, %v214_v49 }
  0x42   :  { %v218_v56 = vadd.f32 %v217_v51, %v216_v53 }
  0x44   :  { %v220_v59 = vadd.f32 %v219_v54, %v218_v56 }
  0x46   :  { %v222_v62 = vadd.f32 %v221_v57, %v220_v59  ;;  %v253_v4 = vld.sshfl [vmem:[#allocation1] sm:$0xff pattern:$0x75316420]  ;;  %v254_v5 = vld.sshfl [vmem:[#allocation1 + $0x8] sm:$0xff pattern:$0x75316420] }
  0x47   :  { %v257_v6 = vsel %vm103_vm0, %v253_v4, 0.0  ;;  %v258_v7 = vsel %vm103_vm0, %v254_v5, 0.0 }
  0x48   :  { %v224_v0 = vadd.f32 %v223_v60, %v222_v62  ;;  %v259_v8 = vadd.f32 %v258_v7, %v257_v6 }
  0x4a   :  { %v226_v2 = vadd.f32 %v225_v63, %v224_v0 }
  0x4c   :  { %v228_v3 = vadd.f32 %v227_v1, %v226_v2 }
  0x4e   :  { %229 = vadd.xlane.f32.xlu0 %v228_v3 }
  0x56   :  { %260 = vadd.xlane.f32.xlu0 %v259_v8 }
  0xae   :  { %v173_v47 = vpop.xlane.xlu1 %172 }
  0xaf   :  { %v174_v48 = vrot.slane %v173_v47, 4 }
  0xb1   :  { %v175_v49 = vadd.f32 %v174_v48, %v173_v47 }
  0xb3   :  { %v176_v50 = vrot.slane %v175_v49, 2 }
  0xb5   :  { %v177_v51 = vadd.f32 %v176_v50, %v175_v49 }
  0xb7   :  { %v178_v52 = vrot.slane %v177_v51, 1 }
  0xb9   :  { %v179_v53 = vadd.f32 %v178_v52, %v177_v51 }
  0xbb   :  { %309 = vpush %v179_v53 }
  0xc1   :  { %v230_v16 = vpop.xlane.xlu0 %229 }
  0xc2   :  { %v308_v17 = vmul.f32 -1.442695, %v230_v16 }
  0xc4   :  { %323 = vpow2.f32 %v308_v17 }
  0xc9   :  { %v261_v31 = vpop.xlane.xlu0 %260 }
  0xca   :  { %v324_v18 = vpop.eup %323  ;;  %vm262_vm7 = vcmp.gt.f32.partialorder %v261_v31, 0.0 }
  0xcb   :  { %v234_v19 = vadd.f32 1.0, %v324_v18  ;;  %v263_v34 = vsel %vm262_vm7, 1.0, %v451_v33 }
  0xcc   :  { %v272_v39 = vsub.f32 1.0, %v263_v34 }
  0xcd   :  { %325 = vrcp.f32 %v234_v19  ;;  %v246_v23 = vand.u32 2147483648, %v234_v19  ;;  %v244_v25 = vand.u32 2147483647, %v234_v19  ;;  %vm240_vm4 = vweird.f32 %v234_v19 }
  0xcf   :  { %v247_v27 = vor.u32 1.1754944e-38, %v246_v23  ;;  %vm245_vm6 = vcmp.eq.f32.partialorder %v244_v25, 8.507059e+37 }
  0xd3   :  { %v326_v20 = vpop.eup %325 }
  0xd4   :  { %v236_v21 = vmul.f32 %v326_v20, %v234_v19  ;;  %vm241_vm3 = vweird.f32 %v326_v20 }
  0xd5   :  { %vm242_vm5 = vmor %vm240_vm4, %vm241_vm3 }
  0xd6   :  { %v237_v22 = vsub.f32 1.0, %v236_v21 }
  0xd8   :  { %v238_v24 = vmul.f32 %v326_v20, %v237_v22 }
  0xda   :  { %v239_v26 = vadd.f32 %v326_v20, %v238_v24 }
  0xdc   :  { %v243_v28 = vsel %vm242_vm5, %v326_v20, %v239_v26 }
  0xdd   :  { %v248_v29 = vsel %vm245_vm6, %v247_v27, %v243_v28 }
  0xde   :  { %327 = vlog2.f32 %v248_v29  ;;  %v267_v30 = vsub.f32 1.0, %v248_v29 }
  0xe0   :  { %329 = vlog2.f32 %v267_v30 }
  0xe4   :  { %v328_v32 = vpop.eup %327 }
  0xe5   :  { %v265_v35 = vmul.f32 0.6931472, %v328_v32 }
  0xe6   :  { %v330_v36 = vpop.eup %329 }
  0xe7   :  { %v266_v37 = vmax.f32 %v265_v35, -100.0  ;;  %v269_v38 = vmul.f32 0.6931472, %v330_v36 }
  0xe9   :  { %v270_v40 = vmax.f32 %v269_v38, -100.0  ;;  %v271_v41 = vmul.f32 %v266_v37, %v263_v34 }
  0xeb   :  { %v273_v42 = vmul.f32 %v272_v39, %v270_v40 }
  0xec   :  { %s310_s2 = spop %309 }
  0xed   :  { %v274_v43 = vadd.f32 %v273_v42, %v271_v41  ;;  %182 = sst [smem:[#allocation11 + $0x1]] %s310_s2 }
  0xef   :  { %v275_v44 = vsub.f32 0.0, %v274_v43 }
  0xf1   :  { %v276_v45 = vsel %vm129_vm2, %v275_v44, 0.0 }
  0xf2   :  { %v278_v46 = vsel %vm277_vm8, %v276_v45, 0.0 }
  0xf3   :  { %279 = vadd.xlane.f32.xlu1 %v278_v46 }
 0x166   :  { %v280_v54 = vpop.xlane.xlu1 %279 }
 0x167   :  { %v281_v55 = vrot.slane %v280_v54, 4 }
 0x169   :  { %v282_v56 = vadd.f32 %v281_v55, %v280_v54 }
 0x16b   :  { %v283_v57 = vrot.slane %v282_v56, 2 }
 0x16d   :  { %v284_v58 = vadd.f32 %v283_v57, %v282_v56 }
 0x16f   :  { %v285_v59 = vrot.slane %v284_v58, 1 }
 0x171   :  { %v286_v60 = vadd.f32 %v285_v59, %v284_v58 }
 0x173   :  { %311 = vpush %v286_v60 }
 0x1a4   :  { %s312_s9 = spop %311 }
 0x1a5   :  { %289 = sst [smem:[#allocation11]] %s312_s9 }
 0x1a6   :  { %298 = dma.smem_to_hbm %s452_s10, 16, %s296_s8, [#allocation5]  }
 0x1a7   :  { %445 = dma.done.wait [#allocation5], 16  }
 0x1a8   :  { %446 = vsyncadd [#allocation5], 4294967280 }
 0x1a9   :  { %303 = sfence }
 0x1aa   :  { %304 = vsyncpa [#allocation4], 1 }
 0x1ab   :  { %305 = vsyncpa [#allocation7], 1 }
 0x1ac   :  { %306 = vsyncpa [#allocation10], 1 }
 0x1ad   :  { %307 = vsyncpa [#allocation5], 1 }

</bundles_post_ra>
